<compile_context>
chip_gen: v6e
topology: v6e:2x2x1
jax: 0.10.0
libtpu: 0.0.40
codegen_flags: <defaults>
</compile_context>

<pallas_src>
import functools

import jax
import jax.numpy as jnp
from jax.experimental import pallas as pl
from jax.experimental.pallas import tpu as pltpu


def _leaky_relu(x, slope=0.01):
    # Single VALU op; identical to nn.LeakyReLU(0.01) for finite inputs.
    return jnp.maximum(x, slope * x)


def _round_up(n, m):
    return ((n + m - 1) // m) * m


def _epilogue_dtype():
    """bf16 elementwise epilogue on v6e/v7x (bf16 VPU); f32 elsewhere (v5e...)."""
    try:
        kind = jax.devices()[0].device_kind.lower()
    except Exception:
        return jnp.float32
    if "v6" in kind or "v7" in kind:
        return jnp.bfloat16
    return jnp.float32


def clique_energy_kernel(x_ref,
                         w1_ref, b1_ref,
                         w2_ref, b2_ref,
                         w3_ref, b3_ref,
                         w4_ref, b4_ref,
                         o_ref, *, ep_dtype):
    """One batch tile of the MLP. Weights are bf16; dots accumulate in f32."""
    # Cast f32 -> bf16 on the VPU; hides under the input DMA and halves the
    # wrapper-side HBM traffic compared with pre-casting the whole array.
    x = x_ref[...].astype(jnp.bfloat16)                               # [TM, 128]

    h = jnp.dot(x, w1_ref[...], preferred_element_type=jnp.float32)
    h = _leaky_relu(h.astype(ep_dtype) + b1_ref[...])                 # [TM, 64]

    h = jnp.dot(h.astype(jnp.bfloat16), w2_ref[...],
                preferred_element_type=jnp.float32)
    h = _leaky_relu(h.astype(ep_dtype) + b2_ref[...])                 # [TM, 32]

    h = jnp.dot(h.astype(jnp.bfloat16), w3_ref[...],
                preferred_element_type=jnp.float32)
    h = _leaky_relu(h.astype(ep_dtype) + b3_ref[...])                 # [TM, 16]
    # TODO(synk): if the vector-extended (MXU push) slot binds on v7x, layer 3
    # could also move to the VPU like layer 4; kept on the MXU pending bundles.

    # Layer 4 (16 -> 1) on the VPU: multiply + lane reduction, no N=1 MXU matmul.
    e = jnp.sum(h.astype(jnp.float32) * w4_ref[...],
                axis=-1, keepdims=True) + b4_ref[...]                 # [TM, 1]

    # Lane-dense store: relayout [TM,1] -> [1,TM] on the (idle) XLU so the
    # output block is a full-width unmasked store instead of 1-lane vst.msk.
    o_ref[...] = jnp.transpose(e).astype(o_ref.dtype)                 # [1, TM]


def _jax_forward(flat, params):
    """Small-batch fast path / correctness reference (pure f32 XLA)."""
    h = flat
    for i in range(1, 5):
        h = h @ params[f"w{i}"] + params[f"b{i}"]
        if i < 4:
            h = jnp.where(h > 0, h, 0.01 * h)
    return h


def _choose_tiling(b, tile_m):
    """Pick (tm, n_tiles, b_pad): small pad (multiple of 16 rows), tm <= tile_m,
    and >= 4 grid steps for large batches so v7x's two TCs both get work."""
    b16 = _round_up(max(b, 1), 16)
    if b16 >= 4096:
        min_tiles = 4
    elif b16 >= 2048:
        min_tiles = 2
    else:
        min_tiles = 1
    n_tiles = max(pl.cdiv(b16, tile_m), min_tiles)
    n_tiles = min(n_tiles, max(b16 // 16, 1))
    tm = _round_up(pl.cdiv(b16, n_tiles), 16)
    return tm, n_tiles, n_tiles * tm


def clique_energy_forward(clique_embeddings, params, *,
                          tile_m=4096,
                          small_batch_threshold=512,
                          force_pallas=False):
    """Mirrors CliqueEnergy.forward.

    clique_embeddings: [clique_size, hidden_dim] or [batch, clique_size, hidden_dim]
    params: dict of (w1,b1,...,w4,b4) with weights in [in, out] layout, biases [1, out].
    Returns energy of shape [batch, 1] (or [1, 1] in non-batch mode).
    """
    batch_mode = clique_embeddings.ndim > 2
    if batch_mode:
        flat = clique_embeddings.reshape(clique_embeddings.shape[0], -1)
    else:
        flat = clique_embeddings.reshape(1, -1)
    b, in_dim = flat.shape

    # Small-batch fast path: launch + 9 operand DMAs dwarf the work below a few
    # hundred rows. Tests force the Pallas path so the kernel is exercised.
    if b < small_batch_threshold and not force_pallas:
        return _jax_forward(flat.astype(jnp.float32), params)

    tm, n_tiles, b_pad = _choose_tiling(b, tile_m)
    if b_pad != b:
        flat = jnp.pad(flat, ((0, b_pad - b), (0, 0)))   # small pad (< n_tiles*16 rows)

    ep_dtype = _epilogue_dtype()

    # bf16 weights for the MXU; layer-4 weight stays f32 (VPU path), row layout [1, 16].
    w1 = params["w1"].astype(jnp.bfloat16)
    w2 = params["w2"].astype(jnp.bfloat16)
    w3 = params["w3"].astype(jnp.bfloat16)
    w4_row = params["w4"].reshape(1, -1).astype(jnp.float32)
    b1 = params["b1"].astype(ep_dtype)
    b2 = params["b2"].astype(ep_dtype)
    b3 = params["b3"].astype(ep_dtype)
    b4 = params["b4"].astype(jnp.float32)

    d0, d1 = w1.shape        # 128, 64
    _, d2 = w2.shape         # 32
    _, d3 = w3.shape         # 16

    const = lambda shape: pl.BlockSpec(shape, lambda i: (0, 0))
    grid_spec = pltpu.PrefetchScalarGridSpec(
        num_scalar_prefetch=0,
        grid=(n_tiles,),
        in_specs=[
            pl.BlockSpec((tm, d0), lambda i: (i, 0)),   # x tile (f32), pipelined
            const((d0, d1)), const((1, d1)),            # w1, b1 (resident)
            const((d1, d2)), const((1, d2)),            # w2, b2
            const((d2, d3)), const((1, d3)),            # w3, b3
            const((1, d3)), const((1, 1)),              # w4 (row), b4
        ],
        # Lane-dense output: one full-width row of tm energies per grid step.
        out_specs=pl.BlockSpec((1, tm), lambda i: (i, 0)),
    )

    flops = b_pad * (2 * (d0 * d1 + d1 * d2 + d2 * d3) + 2 * d3)
    weight_bytes = sum(int(a.size) * a.dtype.itemsize
                       for a in (w1, w2, w3, w4_row, b1, b2, b3, b4))
    bytes_accessed = b_pad * (d0 * 4 + 4) + weight_bytes

    kernel = functools.partial(clique_energy_kernel, ep_dtype=ep_dtype)
    out = pl.pallas_call(
        kernel,
        out_shape=jax.ShapeDtypeStruct((n_tiles, tm), jnp.float32),
        grid_spec=grid_spec,
        compiler_params=pltpu.CompilerParams(
            dimension_semantics=("parallel",),
            vmem_limit_bytes=32 * 1024 * 1024,
        ),
        cost_estimate=pl.CostEstimate(
            flops=flops, transcendentals=0, bytes_accessed=bytes_accessed),
    )(flat, w1, b1, w2, b2, w3, b3, w4_row, b4)

    # (n_tiles, tm) row-major == padded batch order; drop padded rows.
    return out.reshape(b_pad, 1)[:b]


def init_params(key, clique_size, hidden_dim, energy_dim):
    """Deterministic init matching the nn.Linear shapes of the >=4 branch."""
    assert clique_size >= 4, "this script instantiates the clique_size >= 4 branch"
    input_dim = clique_size * hidden_dim
    dims = [input_dim, energy_dim * 2, energy_dim, energy_dim // 2, 1]
    params = {}
    for i in range(4):
        fan_in, fan_out = dims[i], dims[i + 1]
        key, kw, kb = jax.random.split(key, 3)
        bound = 1.0 / jnp.sqrt(fan_in)
        # weights stored [in, out] (transposed vs. PyTorch), biases [1, out]
        params[f"w{i+1}"] = jax.random.uniform(
            kw, (fan_in, fan_out), jnp.float32, -bound, bound)
        params[f"b{i+1}"] = jax.random.uniform(
            kb, (1, fan_out), jnp.float32, -bound, bound)
    return params


def reference_forward(clique_embeddings, params):
    """Pure-JAX f32 reference for correctness check."""
    if clique_embeddings.ndim > 2:
        flat = clique_embeddings.reshape(clique_embeddings.shape[0], -1)
    else:
        flat = clique_embeddings.reshape(1, -1)
    return _jax_forward(flat, params)


if __name__ == "__main__":
    clique_size, hidden_dim, energy_dim = 4, 32, 32

    key = jax.random.PRNGKey(0)
    key, kx, kx2 = jax.random.split(key, 3)
    params = init_params(key, clique_size, hidden_dim, energy_dim)

    # bf16 matmul inputs (and bf16 epilogue on v6e/v7x) vs f32 reference.
    TOL = dict(atol=4e-2, rtol=4e-2)

    # 1) batch mode, small batch, force the Pallas kernel (pads 2 -> 16 rows).
    x = jax.random.normal(kx, (2, clique_size, hidden_dim), jnp.float32)
    energy = jax.block_until_ready(
        clique_energy_forward(x, params, force_pallas=True))
    ref = reference_forward(x, params)
    assert energy.shape == (2, 1), energy.shape
    assert jnp.allclose(energy, ref, **TOL), (energy, ref)

    # 2) non-batch mode: [clique_size, hidden_dim] -> [1, 1].
    e1 = jax.block_until_ready(
        clique_energy_forward(x[0], params, force_pallas=True))
    assert e1.shape == (1, 1), e1.shape
    assert jnp.allclose(e1, reference_forward(x[0], params), **TOL)

    # 3) larger batch exercising the grid (300 rows -> 3 tiles of 112, pad 336).
    xb = jax.random.normal(kx2, (300, clique_size, hidden_dim), jnp.float32)
    eb = jax.block_until_ready(
        clique_energy_forward(xb, params, tile_m=128, force_pallas=True))
    refb = reference_forward(xb, params)
    assert eb.shape == (300, 1), eb.shape
    assert jnp.allclose(eb, refb, **TOL), jnp.max(jnp.abs(eb - refb))

    # 4) small-batch fast path (pure-JAX) matches the reference exactly.
    ef = jax.block_until_ready(clique_energy_forward(x, params))
    assert jnp.allclose(ef, ref, atol=1e-5, rtol=1e-5)

    print("KERNEL_OK")
</pallas_src>

<mosaic_0001>
module attributes {stable_mosaic.version = 11 : i64} {
  func.func @clique_energy_kernel(%arg0: i32, %arg1: memref<16x128xf32, #tpu.memory_space<vmem>>, %arg2: memref<128x64xbf16, #tpu.memory_space<vmem>>, %arg3: memref<1x64xf32, #tpu.memory_space<vmem>>, %arg4: memref<64x32xbf16, #tpu.memory_space<vmem>>, %arg5: memref<1x32xf32, #tpu.memory_space<vmem>>, %arg6: memref<32x16xbf16, #tpu.memory_space<vmem>>, %arg7: memref<1x16xf32, #tpu.memory_space<vmem>>, %arg8: memref<1x16xf32, #tpu.memory_space<vmem>>, %arg9: memref<1x1xf32, #tpu.memory_space<vmem>>, %arg10: memref<1x16xf32, #tpu.memory_space<vmem>>) attributes {dimension_semantics = [#tpu.dimension_semantics<parallel>], iteration_bounds = array<i64: 1>, scalar_prefetch = 0 : i64, scratch_operands = 0 : i64, tpu.core_type = #tpu.core_type<tc>, window_params = [{transform_indices = @transform_0, window_bounds = array<i64: 16, 128>}, {pipeline_mode = #tpu.pipeline_mode<synchronous>, transform_indices = @transform_1, window_bounds = array<i64: 128, 64>}, {pipeline_mode = #tpu.pipeline_mode<synchronous>, transform_indices = @transform_2, window_bounds = array<i64: 1, 64>}, {pipeline_mode = #tpu.pipeline_mode<synchronous>, transform_indices = @transform_3, window_bounds = array<i64: 64, 32>}, {pipeline_mode = #tpu.pipeline_mode<synchronous>, transform_indices = @transform_4, window_bounds = array<i64: 1, 32>}, {pipeline_mode = #tpu.pipeline_mode<synchronous>, transform_indices = @transform_5, window_bounds = array<i64: 32, 16>}, {pipeline_mode = #tpu.pipeline_mode<synchronous>, transform_indices = @transform_6, window_bounds = array<i64: 1, 16>}, {pipeline_mode = #tpu.pipeline_mode<synchronous>, transform_indices = @transform_7, window_bounds = array<i64: 1, 16>}, {pipeline_mode = #tpu.pipeline_mode<synchronous>, transform_indices = @transform_8, window_bounds = array<i64: 1, 1>}, {transform_indices = @transform_9, window_bounds = array<i64: 1, 16>}]} {
    %c0 = arith.constant 0 : index
    %c0_0 = arith.constant 0 : index
    %0 = vector.load %arg1[%c0, %c0_0] : memref<16x128xf32, #tpu.memory_space<vmem>>, vector<16x128xf32>
    %1 = arith.truncf %0 : vector<16x128xf32> to vector<16x128xbf16>
    %c0_1 = arith.constant 0 : index
    %c0_2 = arith.constant 0 : index
    %2 = vector.load %arg2[%c0_1, %c0_2] : memref<128x64xbf16, #tpu.memory_space<vmem>>, vector<128x64xbf16>
    %cst = arith.constant dense<0.000000e+00> : vector<16x64xf32>
    %3 = tpu.matmul %1, %2, %cst {dimension_numbers = #tpu.dot_dimension_numbers<[1], [0], [0], [1], [0, 0, 1, 1], [], []>} : vector<16x128xbf16>, vector<128x64xbf16>, vector<16x64xf32> -> vector<16x64xf32>
    %c0_3 = arith.constant 0 : index
    %c0_4 = arith.constant 0 : index
    %4 = vector.load %arg3[%c0_3, %c0_4] : memref<1x64xf32, #tpu.memory_space<vmem>>, vector<1x64xf32>
    %5 = vector.broadcast %4 : vector<1x64xf32> to vector<16x64xf32>
    %6 = arith.addf %3, %5 : vector<16x64xf32>
    %cst_5 = arith.constant 0.00999999977 : f32
    %7 = vector.broadcast %cst_5 : f32 to vector<16x64xf32>
    %8 = arith.mulf %7, %6 : vector<16x64xf32>
    %9 = arith.maximumf %6, %8 : vector<16x64xf32>
    %10 = arith.truncf %9 : vector<16x64xf32> to vector<16x64xbf16>
    %c0_6 = arith.constant 0 : index
    %c0_7 = arith.constant 0 : index
    %11 = vector.load %arg4[%c0_6, %c0_7] : memref<64x32xbf16, #tpu.memory_space<vmem>>, vector<64x32xbf16>
    %cst_8 = arith.constant dense<0.000000e+00> : vector<16x32xf32>
    %12 = tpu.matmul %10, %11, %cst_8 {dimension_numbers = #tpu.dot_dimension_numbers<[1], [0], [0], [1], [0, 0, 1, 1], [], []>} : vector<16x64xbf16>, vector<64x32xbf16>, vector<16x32xf32> -> vector<16x32xf32>
    %c0_9 = arith.constant 0 : index
    %c0_10 = arith.constant 0 : index
    %13 = vector.load %arg5[%c0_9, %c0_10] : memref<1x32xf32, #tpu.memory_space<vmem>>, vector<1x32xf32>
    %14 = vector.broadcast %13 : vector<1x32xf32> to vector<16x32xf32>
    %15 = arith.addf %12, %14 : vector<16x32xf32>
    %cst_11 = arith.constant 0.00999999977 : f32
    %16 = vector.broadcast %cst_11 : f32 to vector<16x32xf32>
    %17 = arith.mulf %16, %15 : vector<16x32xf32>
    %18 = arith.maximumf %15, %17 : vector<16x32xf32>
    %19 = arith.truncf %18 : vector<16x32xf32> to vector<16x32xbf16>
    %c0_12 = arith.constant 0 : index
    %c0_13 = arith.constant 0 : index
    %20 = vector.load %arg6[%c0_12, %c0_13] : memref<32x16xbf16, #tpu.memory_space<vmem>>, vector<32x16xbf16>
    %cst_14 = arith.constant dense<0.000000e+00> : vector<16x16xf32>
    %21 = tpu.matmul %19, %20, %cst_14 {dimension_numbers = #tpu.dot_dimension_numbers<[1], [0], [0], [1], [0, 0, 1, 1], [], []>} : vector<16x32xbf16>, vector<32x16xbf16>, vector<16x16xf32> -> vector<16x16xf32>
    %c0_15 = arith.constant 0 : index
    %c0_16 = arith.constant 0 : index
    %22 = vector.load %arg7[%c0_15, %c0_16] : memref<1x16xf32, #tpu.memory_space<vmem>>, vector<1x16xf32>
    %23 = vector.broadcast %22 : vector<1x16xf32> to vector<16x16xf32>
    %24 = arith.addf %21, %23 : vector<16x16xf32>
    %cst_17 = arith.constant 0.00999999977 : f32
    %25 = vector.broadcast %cst_17 : f32 to vector<16x16xf32>
    %26 = arith.mulf %25, %24 : vector<16x16xf32>
    %27 = arith.maximumf %24, %26 : vector<16x16xf32>
    %c0_18 = arith.constant 0 : index
    %c0_19 = arith.constant 0 : index
    %28 = vector.load %arg8[%c0_18, %c0_19] : memref<1x16xf32, #tpu.memory_space<vmem>>, vector<1x16xf32>
    %29 = vector.broadcast %28 : vector<1x16xf32> to vector<16x16xf32>
    %30 = arith.mulf %27, %29 : vector<16x16xf32>
    %cst_20 = arith.constant dense<0.000000e+00> : vector<16xf32>
    %31 = vector.multi_reduction <add>, %30, %cst_20 [1] : vector<16x16xf32> to vector<16xf32>
    %32 = vector.shape_cast %31 : vector<16xf32> to vector<16x1xf32>
    %c0_21 = arith.constant 0 : index
    %c0_22 = arith.constant 0 : index
    %33 = vector.load %arg9[%c0_21, %c0_22] : memref<1x1xf32, #tpu.memory_space<vmem>>, vector<1x1xf32>
    %34 = vector.broadcast %33 : vector<1x1xf32> to vector<16x1xf32>
    %35 = arith.addf %32, %34 : vector<16x1xf32>
    %36 = tpu.transpose %35, [1, 0] : vector<16x1xf32> -> vector<1x16xf32>
    %c0_23 = arith.constant 0 : index
    %c0_24 = arith.constant 0 : index
    %37 = vector.load %arg10[%c0_23, %c0_24] : memref<1x16xf32, #tpu.memory_space<vmem>>, vector<1x16xf32>
    tpu.vector_store %arg10[%c0_23, %c0_24], %36 {strides = array<i32>} : memref<1x16xf32, #tpu.memory_space<vmem>>, vector<1x16xf32>,
    return
  }
  func.func @transform_0(%arg0: i32) -> (i32, i32) {
    %c0_i32 = arith.constant 0 : i32
    %c0_i32_0 = arith.constant 0 : i32
    return %arg0, %c0_i32 : i32, i32
  }
  func.func @transform_1(%arg0: i32) -> (i32, i32) {
    %c0_i32 = arith.constant 0 : i32
    %c0_i32_0 = arith.constant 0 : i32
    %c0_i32_1 = arith.constant 0 : i32
    return %c0_i32, %c0_i32_0 : i32, i32
  }
  func.func @transform_2(%arg0: i32) -> (i32, i32) {
    %c0_i32 = arith.constant 0 : i32
    %c0_i32_0 = arith.constant 0 : i32
    %c0_i32_1 = arith.constant 0 : i32
    return %c0_i32, %c0_i32_0 : i32, i32
  }
  func.func @transform_3(%arg0: i32) -> (i32, i32) {
    %c0_i32 = arith.constant 0 : i32
    %c0_i32_0 = arith.constant 0 : i32
    %c0_i32_1 = arith.constant 0 : i32
    return %c0_i32, %c0_i32_0 : i32, i32
  }
  func.func @transform_4(%arg0: i32) -> (i32, i32) {
    %c0_i32 = arith.constant 0 : i32
    %c0_i32_0 = arith.constant 0 : i32
    %c0_i32_1 = arith.constant 0 : i32
    return %c0_i32, %c0_i32_0 : i32, i32
  }
  func.func @transform_5(%arg0: i32) -> (i32, i32) {
    %c0_i32 = arith.constant 0 : i32
    %c0_i32_0 = arith.constant 0 : i32
    %c0_i32_1 = arith.constant 0 : i32
    return %c0_i32, %c0_i32_0 : i32, i32
  }
  func.func @transform_6(%arg0: i32) -> (i32, i32) {
    %c0_i32 = arith.constant 0 : i32
    %c0_i32_0 = arith.constant 0 : i32
    %c0_i32_1 = arith.constant 0 : i32
    return %c0_i32, %c0_i32_0 : i32, i32
  }
  func.func @transform_7(%arg0: i32) -> (i32, i32) {
    %c0_i32 = arith.constant 0 : i32
    %c0_i32_0 = arith.constant 0 : i32
    %c0_i32_1 = arith.constant 0 : i32
    return %c0_i32, %c0_i32_0 : i32, i32
  }
  func.func @transform_8(%arg0: i32) -> (i32, i32) {
    %c0_i32 = arith.constant 0 : i32
    %c0_i32_0 = arith.constant 0 : i32
    %c0_i32_1 = arith.constant 0 : i32
    return %c0_i32, %c0_i32_0 : i32, i32
  }
  func.func @transform_9(%arg0: i32) -> (i32, i32) {
    %c0_i32 = arith.constant 0 : i32
    %c0_i32_0 = arith.constant 0 : i32
    return %arg0, %c0_i32 : i32, i32
  }
}

</mosaic_0001>

<bundles_post_ra>
// kernel: tpu_custom_call.1
= control target key start
LH: loop header
LB: loop body
LE: loop exit
PB: predicated region body
PF: predicated region fallthrough
CT: control target
= control target key end

     0   :  { %s629_s0 = inlined_call_operand.vmem [shape: f32[16,128], index: 0, kind: input, shape index: {}]   ;;  %s630_s1 = inlined_call_operand.vmem [shape: bf16[128,64], index: 1, kind: input, shape index: {}]   ;;  %s631_s2 = inlined_call_operand.vmem [shape: f32[1,64], index: 2, kind: input, shape index: {}]   ;;  %s632_s3 = inlined_call_operand.vmem [shape: bf16[64,32], index: 3, kind: input, shape index: {}]   ;;  %s633_s4 = inlined_call_operand.vmem [shape: f32[1,32], index: 4, kind: input, shape index: {}]   ;;  %s634_s5 = inlined_call_operand.vmem [shape: bf16[32,16], index: 5, kind: input, shape index: {}]   ;;  %s635_s6 = inlined_call_operand.vmem [shape: f32[1,16], index: 6, kind: input, shape index: {}]   ;;  %s636_s7 = inlined_call_operand.vmem [shape: f32[1,16], index: 7, kind: input, shape index: {}]   ;;  %s637_s8 = inlined_call_operand.<no memory space> [shape: f32[1,1], index: 8, kind: input, shape index: {}]   ;;  %s638_s9 = inlined_call_operand.hbm [shape: f32[1,16], index: 9, kind: output, shape index: {}]  }
   0x1   :  { %v14_v0 = vstv %s637_s8 }
   0x2   :  { %15 = vst [vmem:[#allocation2] sm:$0x1] %v14_v0 }
   0x3   :  { %v471_v1 = vld [vmem:[%s630_s1 + $0x38] sm:$0xff]   ;;  %v507_v2 = vmov 0.0   ;;  %v472_v3 = vld [vmem:[%s630_s1 + $0x30] sm:$0xff]   ;;  %vm508_vm0 = vmmov 0   ;;  %v473_v4 = vld [vmem:[%s630_s1 + $0x28] sm:$0xff]  }
   0x4   :  { %428 = vmatprep.subr.bf16.mxu0 %v507_v2  ;;  %448 = vmatprep.subr.bf16.mxu1 %v507_v2  ;;  %v474_v5 = vld [vmem:[%s630_s1 + $0x20] sm:$0xff]   ;;  %v479_v6 = vld [vmem:[%s632_s3 + $0x18] sm:$0xff]  }
   0x5   :  { %429 = vmatpush3.bf16.msra.mxu0 %v471_v1  ;;  %444 = vmatprep.mubr.msk.bf16.mxu0 %vm508_vm0, %v507_v2 }
   0x6   :  { %430 = vmatprep.subr.bf16.mxu0 %v507_v2  ;;  %456 = vmatprep.mubr.msk.bf16.mxu1 %vm508_vm0, %v507_v2 }
   0x7   :  { %449 = vmatpush3.bf16.msra.mxu1 %v479_v6 }
   0x8   :  { %450 = vmatprep.subr.bf16.mxu1 %v507_v2 }
   0x9   :  { %431 = vmatpush3.bf16.msra.mxu0 %v472_v3 }
   0xa   :  { %432 = vmatprep.subr.bf16.mxu0 %v507_v2 }
   0xd   :  { %433 = vmatpush3.bf16.msra.mxu0 %v473_v4 }
   0xe   :  { %434 = vmatprep.subr.bf16.mxu0 %v507_v2 }
   0xf   :  { %16 = vsyncpa [#allocation4], 0  ;;  %v475_v7 = vld [vmem:[%s630_s1 + $0x18] sm:$0xff]   ;;  %v476_v8 = vld [vmem:[%s630_s1 + $0x10] sm:$0xff]   ;;  %vm195_vm1 = vcmask 523264   ;;  %vm268_vm2 = vcmask 261120  }
  0x10   :  { %v477_v9 = vld [vmem:[%s630_s1 + $0x8] sm:$0xff]   ;;  %v478_v10 = vld [vmem:[%s630_s1] sm:$0xff]   ;;  %v480_v14 = vld [vmem:[%s632_s3 + $0x10] sm:$0xff]   ;;  %vm326_vm3 = vcmask 130048   ;;  %vm374_vm4 = vcmask 122880  }
  0x11   :  { %435 = vmatpush3.bf16.msra.mxu0 %v474_v5  ;;  %v36_v11 = vld [vmem:[%s629_s0] sm:$0xff]  ;;  %v37_v12 = vld [vmem:[%s629_s0 + $0x8] sm:$0xff]  ;;  %451 = vmatpush3.bf16.msra.mxu1 %v480_v14 }
  0x12   :  { %436 = vmatprep.subr.bf16.mxu0 %v507_v2  ;;  %v38_v13 = vpack.c.bf16 %v37_v12, %v36_v11  ;;  %452 = vmatprep.subr.bf16.mxu1 %v507_v2  ;;  %v481_v15 = vld [vmem:[%s632_s3 + $0x8] sm:$0xff]   ;;  %v482_v16 = vld [vmem:[%s632_s3] sm:$0xff]  }
  0x13   :  { %v390_v17 = vld [vmem:[%s631_s2] ss:$0 sm:$0xff]  ;;  %v483_v29 = vld [vmem:[%s634_s5 + $0x8] sm:$0xff]  }
  0x14   :  { %v484_v30 = vld [vmem:[%s634_s5] sm:$0xff]  }
  0x15   :  { %437 = vmatpush3.bf16.msra.mxu0 %v475_v7  ;;  %453 = vmatpush3.bf16.msra.mxu1 %v481_v15  ;;  %v399_v31 = vld [vmem:[%s633_s4] ss:$0 sm:$0xff] }
  0x16   :  { %438 = vmatprep.subr.bf16.mxu0 %v507_v2  ;;  %454 = vmatprep.subr.bf16.mxu1 %v507_v2  ;;  %v405_v43 = vld [vmem:[%s635_s6] ss:$0 sm:$0xff]  ;;  %s509_s6 = smov [#allocation3]  }
  0x17   :  { %v409_v49 = vld [vmem:[%s636_s7] ss:$0 sm:$0xff]  ;;  %s382_s7 = sshll.u32 %s509_s6, 4  ;;  %s383_s7 = int_to_ptr.vmem [resolvable:$true] %s382_s7 }
  0x18   :  { %v410_v59 = vld [vmem:[#allocation2] ss:$0 sm:$0xff]  ;;  %s485_s22 = scalar_lea.vmem %s383_s7, 16  ;;  %s489_s23 = scalar_lea.vmem %s383_s7, 32 }
  0x19   :  { %439 = vmatpush3.bf16.msra.mxu0 %v476_v8  ;;  %455 = vmatpush3.bf16.msra.mxu1 %v482_v16  ;;  %p486_p0 = scmp.ne.s32.totalorder %s383_s7, %s485_s22  ;;  %p490_p1 = scmp.lt.s32.totalorder %s383_s7, %s383_s7 }
  0x1a   :  { %440 = vmatprep.subr.bf16.mxu0 %v507_v2  ;;  %460 = vmatprep.subr.bf16.mxu1 %v507_v2  ;;  %p491_p2 = scmp.lt.s32.totalorder %s489_s23, %s485_s22 }
  0x1c   :  { %p492_p3 = por %p491_p2, %p490_p1 }
  0x1d   :  { %441 = vmatpush3.bf16.msra.mxu0 %v477_v9 }
  0x1e   :  { %442 = vmatprep.subr.bf16.mxu0 %v507_v2  ;;  %p493_p4 = pnand %p492_p3, %p486_p0 }
  0x21   :  { %443 = vmatpush3.bf16.msra.mxu0 %v478_v10 }
  0x24   :  { %445 = vmatmul.mubr.bf16.vlgmr.msra.gmra.mxu0 %v38_v13 }
  0xe4   :  { %v144_v18 = vpop.f32.mrf.mxu0 }
  0xe5   :  { %v145_v19 = vadd.f32 %v390_v17, %v144_v18 }
  0xe6   :  { %v446_v20 = vpop.f32.mrf.mxu0 }
  0xe7   :  { %v151_v22 = vmul.f32 0.01, %v145_v19 }
  0xe8   :  { %v147_v21 = vpop.f32.mrf.mxu0 }
  0xe9   :  { %v148_v23 = vadd.f32 %v390_v17, %v147_v21  ;;  %v153_v26 = vmax.f32 %v145_v19, %v151_v22 }
  0xea   :  { %v447_v24 = vpop.f32.mrf.mxu0 }
  0xeb   :  { %v152_v25 = vmul.f32 0.01, %v148_v23 }
  0xed   :  { %v154_v27 = vmax.f32 %v148_v23, %v152_v25 }
  0xef   :  { %v155_v28 = vpack.c.bf16 %v154_v27, %v153_v26 }
  0xf1   :  { %457 = vmatmul.mubr.msk.bf16.vlgmr.msra.gmra.mxu1 %vm195_vm1, %v155_v28 }
  0xf2   :  { %464 = vmatprep.mubr.msk.bf16.mxu1 %vm508_vm0, %v507_v2  ;;  %461 = vmatpush3.bf16.msra.mxu1 %v483_v29 }
  0xf3   :  { %462 = vmatprep.subr.bf16.mxu1 %v507_v2 }
  0xf6   :  { %463 = vmatpush3.bf16.msra.mxu1 %v484_v30 }
 0x1b1   :  { %v233_v32 = vpop.f32.mrf.mxu1 }
 0x1b2   :  { %v234_v33 = vadd.f32 %v399_v31, %v233_v32 }
 0x1b3   :  { %v458_v34 = vpop.f32.mrf.mxu1 }
 0x1b4   :  { %v240_v36 = vmul.f32 0.01, %v234_v33 }
 0x1b5   :  { %v236_v35 = vpop.f32.mrf.mxu1 }
 0x1b6   :  { %v237_v37 = vadd.f32 %v399_v31, %v236_v35  ;;  %v242_v40 = vmax.f32 %v234_v33, %v240_v36 }
 0x1b7   :  { %v459_v38 = vpop.f32.mrf.mxu1 }
 0x1b8   :  { %v241_v39 = vmul.f32 0.01, %v237_v37 }
 0x1ba   :  { %v243_v41 = vmax.f32 %v237_v37, %v241_v39 }
 0x1bc   :  { %v244_v42 = vpack.c.bf16 %v243_v41, %v242_v40 }
 0x1be   :  { %465 = vmatmul.mubr.msk.bf16.vlgmr.msra.gmra.mxu1 %vm268_vm2, %v244_v42 }
 0x27e   :  { %v306_v44 = vpop.f32.mrf.mxu1 }
 0x27f   :  { %v307_v45 = vadd.f32 %v405_v43, %v306_v44 }
 0x280   :  { %v466_v46 = vpop.f32.mrf.mxu1 }
 0x281   :  { %v313_v47 = vmul.f32 0.01, %v307_v45 }
 0x282   :  { %v309_v48 = vpop.f32.mrf.mxu1 }
 0x283   :  { %v315_v50 = vmax.f32 %v307_v45, %v313_v47  ;;  %v310_v51 = vadd.f32 %v405_v43, %v309_v48 }
 0x284   :  { %v467_v52 = vpop.f32.mrf.mxu1 }
 0x285   :  { %v314_v53 = vmul.f32 0.01, %v310_v51  ;;  %v324_v54 = vmul.f32 %v409_v49, %v315_v50 }
 0x287   :  { %v316_v55 = vmax.f32 %v310_v51, %v314_v53  ;;  %v327_v56 = vsel %vm326_vm3, %v324_v54, 0.0 }
 0x288   :  { %328 = vadd.xlane.f32.xlu0 %v327_v56 }
 0x289   :  { %v325_v57 = vmul.f32 %v409_v49, %v316_v55 }
 0x28b   :  { %v330_v58 = vsel %vm326_vm3, %v325_v57, 0.0 }
 0x28c   :  { %331 = vadd.xlane.f32.xlu0 %v330_v58 }
 0x311   :  { %v329_v60 = vpop.xlane.xlu0 %328 }
 0x312   :  { %v340_v61 = vadd.f32 %v410_v59, %v329_v60 }
 0x314   :  { %342 = vxpose.xlu1.b32.start [1/2] (short) (narrow) %v340_v61, 8 }
 0x315   :  { %v332_v62 = vpop.xlane.xlu0 %331 }
 0x316   :  { %v341_v63 = vadd.f32 %v410_v59, %v332_v62 }
 0x318   :  { %343 = vxpose.xlu1.b32.end [2/2] (short) (narrow) %v341_v63, 8 }
 0x390   :  { %v358_v0 = vpop.trf.xlu1 }
 0x391   :  { %375 = vst.msk [vmem:[#allocation3] sm:$0x1] %vm374_vm4, %v358_v0 }
 0x392   :  { %496 = shalt.err (!%p493_p4)
}
 0x393   :  { %385 = dma.vmem_to_hbm [thread:$0]  %s383_s7, 16, %s638_s9, [#allocation4]  }
 0x394   :  { %505 = dma.done.wait [#allocation4], 16  }
 0x395   :  { %506 = vsyncadd [#allocation4], 4294967280 }
 0x396   :  { %389 = vsyncpa [#allocation4], 1 }

</bundles_post_ra>
